<compile_context>
chip_gen: v5e
topology: v5e:2x2
jax: 0.10.0
libtpu: 0.0.40
codegen_flags: <defaults>
</compile_context>

<pallas_src>
import functools
from typing import Any, NamedTuple

import jax
import jax.numpy as jnp
import numpy as np
from jax import lax
from jax.experimental import pallas as pl
from jax.experimental.pallas import tpu as pltpu


def _pick_group_size(num_heads, head_dim, target_lanes=128):
    """Smallest divisor G of num_heads with G*head_dim >= target_lanes."""
    for g in range(1, num_heads + 1):
        if num_heads % g == 0 and g * head_dim >= target_lanes:
            return g
    return num_heads


def _vmem_capacity_bytes():
    """Physical VMEM per TensorCore (128 MiB v5e/v6e, 64 MiB v7x)."""
    try:
        info = pltpu.get_tpu_info()
    except Exception:
        return 64 * 2 ** 20
    for attr in ("vmem_capacity_bytes", "vmem_bytes", "vmem_size_bytes"):
        val = getattr(info, attr, None)
        if val:
            return int(val)
    return 64 * 2 ** 20


class PreparedBlockParams(NamedTuple):
    wq_g: Any      # [HG, D, G*dh]  mxu_dtype
    wk_g: Any      # [HG, D, G*dh]
    wv_g: Any      # [HG, D, G*dh]
    wo_g: Any      # [HG, G*dh, D]
    ln_2d: Any     # [1, D] f32
    num_heads: int
    group_size: int
    mxu_dtype: Any


def prepare_block_params(params, *, num_heads, group_size=None,
                         mxu_dtype=jnp.bfloat16):
    """One-time weight layout prep (cache the result across forward calls)."""
    wq, wk, wv, wo, ln_w = params
    D = wq.shape[0]
    dh = D // num_heads
    assert D == num_heads * dh
    if group_size is None:
        group_size = _pick_group_size(num_heads, dh)
    assert num_heads % group_size == 0
    G = group_size
    HG = num_heads // G
    Gdh = G * dh
    # Head-group layout: wq/wk/wv columns h*dh:(h+1)*dh belong to head h, so
    # group g covers contiguous columns g*Gdh:(g+1)*Gdh (rows for Wo).
    wq_g = jnp.reshape(jnp.asarray(wq), (D, HG, Gdh)).transpose(1, 0, 2).astype(mxu_dtype)
    wk_g = jnp.reshape(jnp.asarray(wk), (D, HG, Gdh)).transpose(1, 0, 2).astype(mxu_dtype)
    wv_g = jnp.reshape(jnp.asarray(wv), (D, HG, Gdh)).transpose(1, 0, 2).astype(mxu_dtype)
    wo_g = jnp.reshape(jnp.asarray(wo), (HG, Gdh, D)).astype(mxu_dtype)
    ln_2d = jnp.reshape(jnp.asarray(ln_w), (1, D)).astype(jnp.float32)
    return PreparedBlockParams(wq_g, wk_g, wv_g, wo_g, ln_2d,
                               num_heads, G, mxu_dtype)


def _t5_block_group_kernel(h_ref, m_ref, b_ref,
                           wq_ref, wk_ref, wv_ref, wo_ref, ln_ref,
                           o_ref, xnorm_ref, acc_ref, ctx_ref, *,
                           group_size, head_dim, mxu_dtype, weights_resident):
    """One (batch, head-group) grid step of the wrapped T5 attention block."""
    g = pl.program_id(1)
    G, dh = group_size, head_dim

    # Per-batch init (head-group axis is the inner, sequential axis): compute
    # RMSNorm once, seed the f32 accumulator with the residual.
    @pl.when(g == 0)
    def _():
        x = h_ref[0].astype(jnp.float32)                    # [S, D]
        var = jnp.mean(x * x, axis=-1, keepdims=True)
        xn = x * jax.lax.rsqrt(var + 1e-6) * ln_ref[0][None, :]
        xnorm_ref[...] = xn.astype(mxu_dtype)               # MXU operand dtype
        acc_ref[...] = x                                    # residual (f32)

    xn = xnorm_ref[...]                                     # [S, D] mxu_dtype

    # Resident weights: whole grouped weight is in VMEM, slice group g on the
    # (cheap) leading axis.  Streaming fallback: per-group block, index 0.
    w_idx = g if weights_resident else 0
    wq = wq_ref[w_idx]                                      # [D, G*dh]
    wk = wk_ref[w_idx]
    wv = wv_ref[w_idx]
    wo = wo_ref[w_idx]                                      # [G*dh, D]

    # Lane-dense grouped projections: bf16 operands, f32 accumulation (MXU).
    q = jnp.dot(xn, wq, preferred_element_type=jnp.float32)  # [S, G*dh]
    k = jnp.dot(xn, wk, preferred_element_type=jnp.float32)
    v = jnp.dot(xn, wv, preferred_element_type=jnp.float32)

    mask_row = m_ref[0, 0].astype(jnp.float32)               # [S] (keys)

    # Per-head attention inside the group (short unrolled loop, G small).
    for hh in range(G):
        lo = hh * dh
        q_h = q[:, lo:lo + dh].astype(mxu_dtype)             # [S, dh]
        k_h = k[:, lo:lo + dh].astype(mxu_dtype)
        v_h = v[:, lo:lo + dh].astype(mxu_dtype)

        # scores = q @ k^T via dot_general contracting dh (no XLU transpose).
        scores = lax.dot_general(
            q_h, k_h, dimension_numbers=(((1,), (1,)), ((), ())),
            preferred_element_type=jnp.float32)              # [S, S] f32

        # Two in-place adds (bias bf16 -> f32 upcast; no (b+m) temporary).
        scores = scores + b_ref[0, hh].astype(jnp.float32)
        scores = scores + mask_row[None, :]

        # Softmax over keys in f32 (exp on EUP, approx reciprocal on EUP).
        s_max = jnp.max(scores, axis=-1, keepdims=True)
        e = jnp.exp(scores - s_max)
        denom = jnp.sum(e, axis=-1, keepdims=True)
        attn = e * pl.reciprocal(denom, approx=True)

        ctx_h = jnp.dot(attn.astype(mxu_dtype), v_h,
                        preferred_element_type=jnp.float32)  # [S, dh]
        ctx_ref[:, lo:lo + dh] = ctx_h.astype(mxu_dtype)

    # One wide output-projection matmul per group (K = G*dh), accumulated.
    acc_ref[...] += jnp.dot(ctx_ref[...], wo,
                            preferred_element_type=jnp.float32)  # [S, D]

    @pl.when(g == pl.num_programs(1) - 1)
    def _():
        o_ref[0] = acc_ref[...].astype(o_ref.dtype)


def checkpoint_wrapper_forward(hidden_states, attention_mask, position_bias,
                               params=None, *, num_heads, prepared=None,
                               use_checkpoint=False, training=False,
                               mxu_dtype=jnp.bfloat16, bias_dtype=jnp.bfloat16):
    """Mirrors CheckpointWrapper.forward for the non-None-output case.

    Returns (hidden_states, position_bias) as the wrapped T5 block would.
    position_bias may be per-batch [B,H,S,S] or shared [1,H,S,S].
    Pass `prepared=prepare_block_params(...)` to avoid re-laying-out weights
    on every call (e.g. once per layer, reused across FiD passages).
    """
    B, S, D = hidden_states.shape
    H = num_heads
    if prepared is None:
        prepared = prepare_block_params(params, num_heads=H,
                                        mxu_dtype=mxu_dtype)
    assert prepared.num_heads == H
    mxu_dtype = prepared.mxu_dtype
    G = prepared.group_size
    HG = H // G
    dh = D // H
    Gdh = G * dh
    assert D == H * dh
    assert attention_mask.shape == (B, 1, S)
    assert position_bias.shape[1:] == (H, S, S)
    bias_b = position_bias.shape[0]
    assert bias_b in (1, B)

    # -1e9-style masks and T5 relative biases round fine to bf16; additions
    # still happen in f32 inside the kernel.  The tiny mask stays f32.
    mask_f32 = attention_mask.astype(jnp.float32)
    bias_k = position_bias.astype(bias_dtype)

    w_it = np.dtype(mxu_dtype).itemsize
    bias_it = np.dtype(bias_dtype).itemsize
    hid_it = np.dtype(hidden_states.dtype).itemsize

    vmem_cap = _vmem_capacity_bytes()
    vmem_cap_limit = int(0.85 * vmem_cap)      # headroom for compiler scratch

    # Resident full weights (DMA'd once) unless they'd crowd out the
    # activation tiles -- then fall back to per-group weight streaming.
    weights_resident = (2 * 4 * D * D * w_it) <= int(0.35 * vmem_cap)

    if bias_b == 1:
        bias_index = lambda b, g: (0, g, 0, 0)   # shared bias (T5 default)
    else:
        bias_index = lambda b, g: (b, g, 0, 0)   # per-batch bias

    if weights_resident:
        wqkv_spec = pl.BlockSpec((HG, D, Gdh), lambda b, g: (0, 0, 0))
        wo_spec = pl.BlockSpec((HG, Gdh, D), lambda b, g: (0, 0, 0))
    else:
        wqkv_spec = pl.BlockSpec((1, D, Gdh), lambda b, g: (g, 0, 0))
        wo_spec = pl.BlockSpec((1, Gdh, D), lambda b, g: (g, 0, 0))

    # VMEM budget estimate (generation-aware, no blanket 64 MiB clamp).
    est = 2 * 2 * (S * D * 4)                    # hidden in + out, dbl-buffered
    est += 2 * (G * S * S * bias_it)             # per-group bias tile
    est += 2 * (S * 4) + 2 * (D * 4)             # mask + ln weight
    if weights_resident:
        est += 2 * (4 * D * D * w_it)            # conservative (dbl-buffer)
    else:
        est += 2 * (4 * D * Gdh * w_it)
    est += S * D * w_it + S * D * 4 + S * Gdh * w_it   # xnorm / acc / ctx
    est += 3 * S * S * 4 + 6 * S * Gdh * 4             # softmax + q/k/v temps
    vmem_limit = int(min(max(int(1.5 * est), 16 * 2 ** 20), vmem_cap_limit))

    # Honest DMA accounting: bias is re-fetched per batch even when shared;
    # weights are fetched once when resident, B times when streamed.
    weight_bytes = (4 * D * D * w_it) if weights_resident \
        else (B * 4 * D * D * w_it)
    flops = B * (8 * S * D * D + 4 * S * S * D)
    bytes_accessed = (2 * B * S * D * hid_it + B * H * S * S * bias_it
                      + B * S * 4 + weight_bytes + D * 4)
    transcendentals = B * H * S * S + B * H * S + B * S

    kernel = functools.partial(
        _t5_block_group_kernel, group_size=G, head_dim=dh,
        mxu_dtype=mxu_dtype, weights_resident=weights_resident)

    # TODO(synk): for S >~ 2K (especially v7x's 64 MiB VMEM) add a "parallel"
    # query-tile grid axis with online (flash-style) softmax so the resident
    # scores/bias working set is [Sq, S] instead of [S, S]; that axis also
    # keeps both v7x TensorCores busy when B == 1.
    block_fn = pl.pallas_call(
        kernel,
        out_shape=jax.ShapeDtypeStruct((B, S, D), hidden_states.dtype),
        grid_spec=pltpu.PrefetchScalarGridSpec(
            num_scalar_prefetch=0,
            grid=(B, HG),                         # head-group (reduction) last
            in_specs=[
                pl.BlockSpec((1, S, D), lambda b, g: (b, 0, 0)),     # hidden
                pl.BlockSpec((1, 1, S), lambda b, g: (b, 0, 0)),     # mask
                pl.BlockSpec((1, G, S, S), bias_index),              # bias grp
                wqkv_spec,                                           # wq
                wqkv_spec,                                           # wk
                wqkv_spec,                                           # wv
                wo_spec,                                             # wo
                pl.BlockSpec((1, D), lambda b, g: (0, 0)),           # ln
            ],
            out_specs=pl.BlockSpec((1, S, D), lambda b, g: (b, 0, 0)),
            scratch_shapes=[
                pltpu.VMEM((S, D), mxu_dtype),     # x_norm (once per batch)
                pltpu.VMEM((S, D), jnp.float32),   # f32 output accumulator
                pltpu.VMEM((S, Gdh), mxu_dtype),   # group context buffer
            ],
        ),
        compiler_params=pltpu.CompilerParams(
            dimension_semantics=("parallel", "arbitrary"),
            vmem_limit_bytes=vmem_limit),
        cost_estimate=pl.CostEstimate(
            flops=flops,
            transcendentals=transcendentals,
            bytes_accessed=bytes_accessed),
    )

    def fwd(h_in, mask_in, bias_in):
        return block_fn(h_in, mask_in, bias_in,
                        prepared.wq_g, prepared.wk_g, prepared.wv_g,
                        prepared.wo_g, prepared.ln_2d)

    if use_checkpoint and training:
        # Gradient checkpointing: identical forward, recompute on backward.
        # (PyTorch's empty-tensor / None plumbing is not needed in JAX.)
        fwd = jax.checkpoint(fwd)

    new_hidden = fwd(hidden_states, mask_f32, bias_k)
    # T5Block-style output tuple: (hidden_states, position_bias)
    return new_hidden, position_bias


def _reference_forward(hidden_states, attention_mask, position_bias, params,
                       num_heads, mxu_dtype=jnp.float32, bias_dtype=None):
    """Pure-JAX reference. mxu_dtype/bias_dtype mirror the kernel precision."""
    wq, wk, wv, wo, ln_w = params
    B, S, D = hidden_states.shape
    H = num_heads
    dh = D // H
    x = hidden_states.astype(jnp.float32)
    var = jnp.mean(x * x, axis=-1, keepdims=True)
    x_norm = x * jax.lax.rsqrt(var + 1e-6) * ln_w

    def mm(a, b):
        return jnp.matmul(a.astype(mxu_dtype), b.astype(mxu_dtype),
                          preferred_element_type=jnp.float32)

    q = mm(x_norm, wq).reshape(B, S, H, dh).transpose(0, 2, 1, 3)
    k = mm(x_norm, wk).reshape(B, S, H, dh).transpose(0, 2, 1, 3)
    v = mm(x_norm, wv).reshape(B, S, H, dh).transpose(0, 2, 1, 3)
    scores = jnp.einsum("bhqd,bhkd->bhqk",
                        q.astype(mxu_dtype), k.astype(mxu_dtype),
                        preferred_element_type=jnp.float32)
    pb = position_bias
    if bias_dtype is not None:
        pb = pb.astype(bias_dtype).astype(jnp.float32)
    scores = scores + pb + attention_mask[:, :, None, :]
    attn = jax.nn.softmax(scores, axis=-1)
    ctx = jnp.einsum("bhqk,bhkd->bhqd",
                     attn.astype(mxu_dtype), v.astype(mxu_dtype),
                     preferred_element_type=jnp.float32)
    ctx = ctx.transpose(0, 2, 1, 3).reshape(B, S, D)
    return x + mm(ctx, wo)


if __name__ == "__main__":
    B, S, D, H = 2, 8, 32, 4

    key = jax.random.PRNGKey(0)
    k_h, k_b, k_q, k_k, k_v, k_o = jax.random.split(key, 6)

    hidden_states = jax.random.normal(k_h, (B, S, D), dtype=jnp.float32)
    position_bias = 0.1 * jax.random.normal(k_b, (B, H, S, S),
                                            dtype=jnp.float32)
    # Additive mask: batch 1 masks out the last 2 key positions.
    mask_bool = jnp.ones((B, 1, S), dtype=bool).at[1, 0, -2:].set(False)
    attention_mask = jnp.where(mask_bool, 0.0, -1e9).astype(jnp.float32)

    scale = 0.05
    params = (
        scale * jax.random.normal(k_q, (D, D), dtype=jnp.float32),  # wq
        scale * jax.random.normal(k_k, (D, D), dtype=jnp.float32),  # wk
        scale * jax.random.normal(k_v, (D, D), dtype=jnp.float32),  # wv
        scale * jax.random.normal(k_o, (D, D), dtype=jnp.float32),  # wo
        jnp.ones((D,), dtype=jnp.float32),                          # ln weight
    )

    # Weight layout prep done once (cacheable across calls / FiD passages).
    prepared = prepare_block_params(params, num_heads=H,
                                    mxu_dtype=jnp.bfloat16)

    out_hidden, out_bias = checkpoint_wrapper_forward(
        hidden_states, attention_mask, position_bias, params,
        num_heads=H, prepared=prepared, use_checkpoint=False, training=False,
        mxu_dtype=jnp.bfloat16, bias_dtype=jnp.bfloat16)
    jax.block_until_ready(out_hidden)

    # Tight check against a precision-matched (bf16 MXU + bf16 bias) reference.
    ref_bf16 = _reference_forward(hidden_states, attention_mask, position_bias,
                                  params, H, mxu_dtype=jnp.bfloat16,
                                  bias_dtype=jnp.bfloat16)
    np.testing.assert_allclose(np.asarray(out_hidden), np.asarray(ref_bf16),
                               rtol=1e-2, atol=1e-2)
    # Sanity check against the full-f32 reference (looser: bf16 + approx recip).
    ref_f32 = _reference_forward(hidden_states, attention_mask, position_bias,
                                 params, H, mxu_dtype=jnp.float32)
    np.testing.assert_allclose(np.asarray(out_hidden), np.asarray(ref_f32),
                               rtol=5e-2, atol=5e-2)
    assert out_bias.shape == (B, H, S, S)

    print("KERNEL_OK")
</pallas_src>

<mosaic_0001>
module attributes {stable_mosaic.version = 11 : i64} {
  func.func @_t5_block_group_kernel(%arg0: i32, %arg1: i32, %arg2: memref<1x8x32xf32, #tpu.memory_space<vmem>>, %arg3: memref<1x1x8xf32, #tpu.memory_space<vmem>>, %arg4: memref<1x4x8x8xbf16, #tpu.memory_space<vmem>>, %arg5: memref<1x32x32xbf16, #tpu.memory_space<vmem>>, %arg6: memref<1x32x32xbf16, #tpu.memory_space<vmem>>, %arg7: memref<1x32x32xbf16, #tpu.memory_space<vmem>>, %arg8: memref<1x32x32xbf16, #tpu.memory_space<vmem>>, %arg9: memref<1x32xf32, #tpu.memory_space<vmem>>, %arg10: memref<1x8x32xf32, #tpu.memory_space<vmem>>, %arg11: memref<8x32xbf16, #tpu.memory_space<vmem>>, %arg12: memref<8x32xf32, #tpu.memory_space<vmem>>, %arg13: memref<8x32xbf16, #tpu.memory_space<vmem>>) attributes {dimension_semantics = [#tpu.dimension_semantics<parallel>, #tpu.dimension_semantics<arbitrary>], iteration_bounds = array<i64: 2, 1>, scalar_prefetch = 0 : i64, scratch_operands = 3 : i64, tpu.core_type = #tpu.core_type<tc>, window_params = [{transform_indices = @transform_0, window_bounds = array<i64: 1, 8, 32>}, {transform_indices = @transform_1, window_bounds = array<i64: 1, 1, 8>}, {transform_indices = @transform_2, window_bounds = array<i64: 1, 4, 8, 8>}, {pipeline_mode = #tpu.pipeline_mode<synchronous>, transform_indices = @transform_3, window_bounds = array<i64: 1, 32, 32>}, {pipeline_mode = #tpu.pipeline_mode<synchronous>, transform_indices = @transform_4, window_bounds = array<i64: 1, 32, 32>}, {pipeline_mode = #tpu.pipeline_mode<synchronous>, transform_indices = @transform_5, window_bounds = array<i64: 1, 32, 32>}, {pipeline_mode = #tpu.pipeline_mode<synchronous>, transform_indices = @transform_6, window_bounds = array<i64: 1, 32, 32>}, {pipeline_mode = #tpu.pipeline_mode<synchronous>, transform_indices = @transform_7, window_bounds = array<i64: 1, 32>}, {transform_indices = @transform_8, window_bounds = array<i64: 1, 8, 32>}]} {
    %c0_i32 = arith.constant 0 : i32
    %0 = arith.cmpi eq, %arg1, %c0_i32 : i32
    %1 = arith.extui %0 : i1 to i32
    %c0_i32_0 = arith.constant 0 : i32
    %2 = arith.cmpi ne, %1, %c0_i32_0 : i32
    scf.if %2 {
      %c0_58 = arith.constant 0 : index
      %c0_59 = arith.constant 0 : index
      %c0_60 = arith.constant 0 : index
      %141 = vector.load %arg2[%c0_58, %c0_59, %c0_60] : memref<1x8x32xf32, #tpu.memory_space<vmem>>, vector<1x8x32xf32>
      %142 = vector.shape_cast %141 : vector<1x8x32xf32> to vector<8x32xf32>
      %143 = arith.mulf %142, %142 : vector<8x32xf32>
      %cst_61 = arith.constant dense<0.000000e+00> : vector<8xf32>
      %144 = vector.multi_reduction <add>, %143, %cst_61 [1] : vector<8x32xf32> to vector<8xf32>
      %145 = vector.shape_cast %144 : vector<8xf32> to vector<8x1xf32>
      %cst_62 = arith.constant 3.200000e+01 : f32
      %146 = vector.broadcast %cst_62 : f32 to vector<8x1xf32>
      %147 = arith.divf %145, %146 : vector<8x1xf32>
      %cst_63 = arith.constant 9.99999997E-7 : f32
      %148 = vector.broadcast %cst_63 : f32 to vector<8x1xf32>
      %149 = arith.addf %147, %148 : vector<8x1xf32>
      %150 = math.rsqrt %149 : vector<8x1xf32>
      %151 = vector.broadcast %150 : vector<8x1xf32> to vector<8x32xf32>
      %152 = arith.mulf %142, %151 : vector<8x32xf32>
      %c0_64 = arith.constant 0 : index
      %c0_65 = arith.constant 0 : index
      %153 = vector.load %arg9[%c0_64, %c0_65] : memref<1x32xf32, #tpu.memory_space<vmem>>, vector<1x32xf32>
      %154 = vector.shape_cast %153 : vector<1x32xf32> to vector<32xf32>
      %155 = vector.shape_cast %154 : vector<32xf32> to vector<1x32xf32>
      %156 = vector.broadcast %155 : vector<1x32xf32> to vector<8x32xf32>
      %157 = arith.mulf %152, %156 : vector<8x32xf32>
      %158 = arith.truncf %157 : vector<8x32xf32> to vector<8x32xbf16>
      %c0_66 = arith.constant 0 : index
      %c0_67 = arith.constant 0 : index
      %159 = vector.load %arg11[%c0_66, %c0_67] : memref<8x32xbf16, #tpu.memory_space<vmem>>, vector<8x32xbf16>
      tpu.vector_store %arg11[%c0_66, %c0_67], %158 {strides = array<i32>} : memref<8x32xbf16, #tpu.memory_space<vmem>>, vector<8x32xbf16>,
      %c0_68 = arith.constant 0 : index
      %c0_69 = arith.constant 0 : index
      %160 = vector.load %arg12[%c0_68, %c0_69] : memref<8x32xf32, #tpu.memory_space<vmem>>, vector<8x32xf32>
      tpu.vector_store %arg12[%c0_68, %c0_69], %142 {strides = array<i32>} : memref<8x32xf32, #tpu.memory_space<vmem>>, vector<8x32xf32>,
    } else {
    }
    %c0 = arith.constant 0 : index
    %c0_1 = arith.constant 0 : index
    %3 = vector.load %arg11[%c0, %c0_1] : memref<8x32xbf16, #tpu.memory_space<vmem>>, vector<8x32xbf16>
    %4 = arith.index_cast %arg1 : i32 to index
    %c0_2 = arith.constant 0 : index
    %c0_3 = arith.constant 0 : index
    %5 = vector.load %arg5[%4, %c0_2, %c0_3] : memref<1x32x32xbf16, #tpu.memory_space<vmem>>, vector<1x32x32xbf16>
    %6 = vector.shape_cast %5 : vector<1x32x32xbf16> to vector<32x32xbf16>
    %7 = arith.index_cast %arg1 : i32 to index
    %c0_4 = arith.constant 0 : index
    %c0_5 = arith.constant 0 : index
    %8 = vector.load %arg6[%7, %c0_4, %c0_5] : memref<1x32x32xbf16, #tpu.memory_space<vmem>>, vector<1x32x32xbf16>
    %9 = vector.shape_cast %8 : vector<1x32x32xbf16> to vector<32x32xbf16>
    %10 = arith.index_cast %arg1 : i32 to index
    %c0_6 = arith.constant 0 : index
    %c0_7 = arith.constant 0 : index
    %11 = vector.load %arg7[%10, %c0_6, %c0_7] : memref<1x32x32xbf16, #tpu.memory_space<vmem>>, vector<1x32x32xbf16>
    %12 = vector.shape_cast %11 : vector<1x32x32xbf16> to vector<32x32xbf16>
    %13 = arith.index_cast %arg1 : i32 to index
    %c0_8 = arith.constant 0 : index
    %c0_9 = arith.constant 0 : index
    %14 = vector.load %arg8[%13, %c0_8, %c0_9] : memref<1x32x32xbf16, #tpu.memory_space<vmem>>, vector<1x32x32xbf16>
    %15 = vector.shape_cast %14 : vector<1x32x32xbf16> to vector<32x32xbf16>
    %cst = arith.constant dense<0.000000e+00> : vector<8x32xf32>
    %16 = tpu.matmul %3, %6, %cst {dimension_numbers = #tpu.dot_dimension_numbers<[1], [0], [0], [1], [0, 0, 1, 1], [], []>} : vector<8x32xbf16>, vector<32x32xbf16>, vector<8x32xf32> -> vector<8x32xf32>
    %cst_10 = arith.constant dense<0.000000e+00> : vector<8x32xf32>
    %17 = tpu.matmul %3, %9, %cst_10 {dimension_numbers = #tpu.dot_dimension_numbers<[1], [0], [0], [1], [0, 0, 1, 1], [], []>} : vector<8x32xbf16>, vector<32x32xbf16>, vector<8x32xf32> -> vector<8x32xf32>
    %cst_11 = arith.constant dense<0.000000e+00> : vector<8x32xf32>
    %18 = tpu.matmul %3, %12, %cst_11 {dimension_numbers = #tpu.dot_dimension_numbers<[1], [0], [0], [1], [0, 0, 1, 1], [], []>} : vector<8x32xbf16>, vector<32x32xbf16>, vector<8x32xf32> -> vector<8x32xf32>
    %c0_12 = arith.constant 0 : index
    %c0_13 = arith.constant 0 : index
    %c0_14 = arith.constant 0 : index
    %19 = vector.load %arg3[%c0_12, %c0_13, %c0_14] : memref<1x1x8xf32, #tpu.memory_space<vmem>>, vector<1x1x8xf32>
    %20 = vector.shape_cast %19 : vector<1x1x8xf32> to vector<8xf32>
    %21 = vector.extract_strided_slice %16 {offsets = [0, 0], sizes = [8, 8], strides = [1, 1]} : vector<8x32xf32> to vector<8x8xf32>
    %22 = arith.truncf %21 : vector<8x8xf32> to vector<8x8xbf16>
    %23 = vector.extract_strided_slice %17 {offsets = [0, 0], sizes = [8, 8], strides = [1, 1]} : vector<8x32xf32> to vector<8x8xf32>
    %24 = arith.truncf %23 : vector<8x8xf32> to vector<8x8xbf16>
    %25 = vector.extract_strided_slice %18 {offsets = [0, 0], sizes = [8, 8], strides = [1, 1]} : vector<8x32xf32> to vector<8x8xf32>
    %26 = arith.truncf %25 : vector<8x8xf32> to vector<8x8xbf16>
    %cst_15 = arith.constant dense<0.000000e+00> : vector<8x8xf32>
    %27 = tpu.matmul %22, %24, %cst_15 {dimension_numbers = #tpu.dot_dimension_numbers<[1], [1], [0], [0], [0, 0, 1, 0], [], []>} : vector<8x8xbf16>, vector<8x8xbf16>, vector<8x8xf32> -> vector<8x8xf32>
    %c0_16 = arith.constant 0 : index
    %c0_17 = arith.constant 0 : index
    %c0_18 = arith.constant 0 : index
    %c0_19 = arith.constant 0 : index
    %28 = vector.load %arg4[%c0_16, %c0_17, %c0_18, %c0_19] : memref<1x4x8x8xbf16, #tpu.memory_space<vmem>>, vector<1x1x8x8xbf16>
    %29 = vector.shape_cast %28 : vector<1x1x8x8xbf16> to vector<8x8xbf16>
    %30 = arith.extf %29 : vector<8x8xbf16> to vector<8x8xf32>
    %31 = arith.addf %27, %30 : vector<8x8xf32>
    %32 = vector.shape_cast %20 : vector<8xf32> to vector<1x8xf32>
    %33 = vector.broadcast %32 : vector<1x8xf32> to vector<8x8xf32>
    %34 = arith.addf %31, %33 : vector<8x8xf32>
    %cst_20 = arith.constant dense<0xFF800000> : vector<8xf32>
    %35 = vector.multi_reduction <maximumf>, %34, %cst_20 [1] : vector<8x8xf32> to vector<8xf32>
    %36 = vector.shape_cast %35 : vector<8xf32> to vector<8x1xf32>
    %37 = vector.broadcast %36 : vector<8x1xf32> to vector<8x8xf32>
    %38 = arith.subf %34, %37 : vector<8x8xf32>
    %39 = math.exp %38 : vector<8x8xf32>
    %cst_21 = arith.constant dense<0.000000e+00> : vector<8xf32>
    %40 = vector.multi_reduction <add>, %39, %cst_21 [1] : vector<8x8xf32> to vector<8xf32>
    %41 = vector.shape_cast %40 : vector<8xf32> to vector<8x1xf32>
    %42 = tpu.reciprocal %41 {approx = true} : vector<8x1xf32> -> vector<8x1xf32>
    %43 = vector.broadcast %42 : vector<8x1xf32> to vector<8x8xf32>
    %44 = arith.mulf %39, %43 : vector<8x8xf32>
    %45 = arith.truncf %44 : vector<8x8xf32> to vector<8x8xbf16>
    %cst_22 = arith.constant dense<0.000000e+00> : vector<8x8xf32>
    %46 = tpu.matmul %45, %26, %cst_22 {dimension_numbers = #tpu.dot_dimension_numbers<[1], [0], [0], [1], [0, 0, 1, 1], [], []>} : vector<8x8xbf16>, vector<8x8xbf16>, vector<8x8xf32> -> vector<8x8xf32>
    %47 = arith.truncf %46 : vector<8x8xf32> to vector<8x8xbf16>
    %c0_23 = arith.constant 0 : index
    %c0_24 = arith.constant 0 : index
    %48 = vector.load %arg13[%c0_23, %c0_24] : memref<8x32xbf16, #tpu.memory_space<vmem>>, vector<8x8xbf16>
    tpu.vector_store %arg13[%c0_23, %c0_24], %47 {strides = array<i32>} : memref<8x32xbf16, #tpu.memory_space<vmem>>, vector<8x8xbf16>,
    %49 = vector.extract_strided_slice %16 {offsets = [0, 8], sizes = [8, 8], strides = [1, 1]} : vector<8x32xf32> to vector<8x8xf32>
    %50 = arith.truncf %49 : vector<8x8xf32> to vector<8x8xbf16>
    %51 = vector.extract_strided_slice %17 {offsets = [0, 8], sizes = [8, 8], strides = [1, 1]} : vector<8x32xf32> to vector<8x8xf32>
    %52 = arith.truncf %51 : vector<8x8xf32> to vector<8x8xbf16>
    %53 = vector.extract_strided_slice %18 {offsets = [0, 8], sizes = [8, 8], strides = [1, 1]} : vector<8x32xf32> to vector<8x8xf32>
    %54 = arith.truncf %53 : vector<8x8xf32> to vector<8x8xbf16>
    %cst_25 = arith.constant dense<0.000000e+00> : vector<8x8xf32>
    %55 = tpu.matmul %50, %52, %cst_25 {dimension_numbers = #tpu.dot_dimension_numbers<[1], [1], [0], [0], [0, 0, 1, 0], [], []>} : vector<8x8xbf16>, vector<8x8xbf16>, vector<8x8xf32> -> vector<8x8xf32>
    %c0_26 = arith.constant 0 : index
    %c1 = arith.constant 1 : index
    %c0_27 = arith.constant 0 : index
    %c0_28 = arith.constant 0 : index
    %56 = vector.load %arg4[%c0_26, %c1, %c0_27, %c0_28] : memref<1x4x8x8xbf16, #tpu.memory_space<vmem>>, vector<1x1x8x8xbf16>
    %57 = vector.shape_cast %56 : vector<1x1x8x8xbf16> to vector<8x8xbf16>
    %58 = arith.extf %57 : vector<8x8xbf16> to vector<8x8xf32>
    %59 = arith.addf %55, %58 : vector<8x8xf32>
    %60 = vector.shape_cast %20 : vector<8xf32> to vector<1x8xf32>
    %61 = vector.broadcast %60 : vector<1x8xf32> to vector<8x8xf32>
    %62 = arith.addf %59, %61 : vector<8x8xf32>
    %cst_29 = arith.constant dense<0xFF800000> : vector<8xf32>
    %63 = vector.multi_reduction <maximumf>, %62, %cst_29 [1] : vector<8x8xf32> to vector<8xf32>
    %64 = vector.shape_cast %63 : vector<8xf32> to vector<8x1xf32>
    %65 = vector.broadcast %64 : vector<8x1xf32> to vector<8x8xf32>
    %66 = arith.subf %62, %65 : vector<8x8xf32>
    %67 = math.exp %66 : vector<8x8xf32>
    %cst_30 = arith.constant dense<0.000000e+00> : vector<8xf32>
    %68 = vector.multi_reduction <add>, %67, %cst_30 [1] : vector<8x8xf32> to vector<8xf32>
    %69 = vector.shape_cast %68 : vector<8xf32> to vector<8x1xf32>
    %70 = tpu.reciprocal %69 {approx = true} : vector<8x1xf32> -> vector<8x1xf32>
    %71 = vector.broadcast %70 : vector<8x1xf32> to vector<8x8xf32>
    %72 = arith.mulf %67, %71 : vector<8x8xf32>
    %73 = arith.truncf %72 : vector<8x8xf32> to vector<8x8xbf16>
    %cst_31 = arith.constant dense<0.000000e+00> : vector<8x8xf32>
    %74 = tpu.matmul %73, %54, %cst_31 {dimension_numbers = #tpu.dot_dimension_numbers<[1], [0], [0], [1], [0, 0, 1, 1], [], []>} : vector<8x8xbf16>, vector<8x8xbf16>, vector<8x8xf32> -> vector<8x8xf32>
    %75 = arith.truncf %74 : vector<8x8xf32> to vector<8x8xbf16>
    %c0_32 = arith.constant 0 : index
    %c8 = arith.constant 8 : index
    %76 = vector.load %arg13[%c0_32, %c8] : memref<8x32xbf16, #tpu.memory_space<vmem>>, vector<8x8xbf16>
    tpu.vector_store %arg13[%c0_32, %c8], %75 {strides = array<i32>} : memref<8x32xbf16, #tpu.memory_space<vmem>>, vector<8x8xbf16>,
    %77 = vector.extract_strided_slice %16 {offsets = [0, 16], sizes = [8, 8], strides = [1, 1]} : vector<8x32xf32> to vector<8x8xf32>
    %78 = arith.truncf %77 : vector<8x8xf32> to vector<8x8xbf16>
    %79 = vector.extract_strided_slice %17 {offsets = [0, 16], sizes = [8, 8], strides = [1, 1]} : vector<8x32xf32> to vector<8x8xf32>
    %80 = arith.truncf %79 : vector<8x8xf32> to vector<8x8xbf16>
    %81 = vector.extract_strided_slice %18 {offsets = [0, 16], sizes = [8, 8], strides = [1, 1]} : vector<8x32xf32> to vector<8x8xf32>
    %82 = arith.truncf %81 : vector<8x8xf32> to vector<8x8xbf16>
    %cst_33 = arith.constant dense<0.000000e+00> : vector<8x8xf32>
    %83 = tpu.matmul %78, %80, %cst_33 {dimension_numbers = #tpu.dot_dimension_numbers<[1], [1], [0], [0], [0, 0, 1, 0], [], []>} : vector<8x8xbf16>, vector<8x8xbf16>, vector<8x8xf32> -> vector<8x8xf32>
    %c0_34 = arith.constant 0 : index
    %c2 = arith.constant 2 : index
    %c0_35 = arith.constant 0 : index
    %c0_36 = arith.constant 0 : index
    %84 = vector.load %arg4[%c0_34, %c2, %c0_35, %c0_36] : memref<1x4x8x8xbf16, #tpu.memory_space<vmem>>, vector<1x1x8x8xbf16>
    %85 = vector.shape_cast %84 : vector<1x1x8x8xbf16> to vector<8x8xbf16>
    %86 = arith.extf %85 : vector<8x8xbf16> to vector<8x8xf32>
    %87 = arith.addf %83, %86 : vector<8x8xf32>
    %88 = vector.shape_cast %20 : vector<8xf32> to vector<1x8xf32>
    %89 = vector.broadcast %88 : vector<1x8xf32> to vector<8x8xf32>
    %90 = arith.addf %87, %89 : vector<8x8xf32>
    %cst_37 = arith.constant dense<0xFF800000> : vector<8xf32>
    %91 = vector.multi_reduction <maximumf>, %90, %cst_37 [1] : vector<8x8xf32> to vector<8xf32>
    %92 = vector.shape_cast %91 : vector<8xf32> to vector<8x1xf32>
    %93 = vector.broadcast %92 : vector<8x1xf32> to vector<8x8xf32>
    %94 = arith.subf %90, %93 : vector<8x8xf32>
    %95 = math.exp %94 : vector<8x8xf32>
    %cst_38 = arith.constant dense<0.000000e+00> : vector<8xf32>
    %96 = vector.multi_reduction <add>, %95, %cst_38 [1] : vector<8x8xf32> to vector<8xf32>
    %97 = vector.shape_cast %96 : vector<8xf32> to vector<8x1xf32>
    %98 = tpu.reciprocal %97 {approx = true} : vector<8x1xf32> -> vector<8x1xf32>
    %99 = vector.broadcast %98 : vector<8x1xf32> to vector<8x8xf32>
    %100 = arith.mulf %95, %99 : vector<8x8xf32>
    %101 = arith.truncf %100 : vector<8x8xf32> to vector<8x8xbf16>
    %cst_39 = arith.constant dense<0.000000e+00> : vector<8x8xf32>
    %102 = tpu.matmul %101, %82, %cst_39 {dimension_numbers = #tpu.dot_dimension_numbers<[1], [0], [0], [1], [0, 0, 1, 1], [], []>} : vector<8x8xbf16>, vector<8x8xbf16>, vector<8x8xf32> -> vector<8x8xf32>
    %103 = arith.truncf %102 : vector<8x8xf32> to vector<8x8xbf16>
    %c0_40 = arith.constant 0 : index
    %c16 = arith.constant 16 : index
    %104 = vector.load %arg13[%c0_40, %c16] : memref<8x32xbf16, #tpu.memory_space<vmem>>, vector<8x8xbf16>
    tpu.vector_store %arg13[%c0_40, %c16], %103 {strides = array<i32>} : memref<8x32xbf16, #tpu.memory_space<vmem>>, vector<8x8xbf16>,
    %105 = vector.extract_strided_slice %16 {offsets = [0, 24], sizes = [8, 8], strides = [1, 1]} : vector<8x32xf32> to vector<8x8xf32>
    %106 = arith.truncf %105 : vector<8x8xf32> to vector<8x8xbf16>
    %107 = vector.extract_strided_slice %17 {offsets = [0, 24], sizes = [8, 8], strides = [1, 1]} : vector<8x32xf32> to vector<8x8xf32>
    %108 = arith.truncf %107 : vector<8x8xf32> to vector<8x8xbf16>
    %109 = vector.extract_strided_slice %18 {offsets = [0, 24], sizes = [8, 8], strides = [1, 1]} : vector<8x32xf32> to vector<8x8xf32>
    %110 = arith.truncf %109 : vector<8x8xf32> to vector<8x8xbf16>
    %cst_41 = arith.constant dense<0.000000e+00> : vector<8x8xf32>
    %111 = tpu.matmul %106, %108, %cst_41 {dimension_numbers = #tpu.dot_dimension_numbers<[1], [1], [0], [0], [0, 0, 1, 0], [], []>} : vector<8x8xbf16>, vector<8x8xbf16>, vector<8x8xf32> -> vector<8x8xf32>
    %c0_42 = arith.constant 0 : index
    %c3 = arith.constant 3 : index
    %c0_43 = arith.constant 0 : index
    %c0_44 = arith.constant 0 : index
    %112 = vector.load %arg4[%c0_42, %c3, %c0_43, %c0_44] : memref<1x4x8x8xbf16, #tpu.memory_space<vmem>>, vector<1x1x8x8xbf16>
    %113 = vector.shape_cast %112 : vector<1x1x8x8xbf16> to vector<8x8xbf16>
    %114 = arith.extf %113 : vector<8x8xbf16> to vector<8x8xf32>
    %115 = arith.addf %111, %114 : vector<8x8xf32>
    %116 = vector.shape_cast %20 : vector<8xf32> to vector<1x8xf32>
    %117 = vector.broadcast %116 : vector<1x8xf32> to vector<8x8xf32>
    %118 = arith.addf %115, %117 : vector<8x8xf32>
    %cst_45 = arith.constant dense<0xFF800000> : vector<8xf32>
    %119 = vector.multi_reduction <maximumf>, %118, %cst_45 [1] : vector<8x8xf32> to vector<8xf32>
    %120 = vector.shape_cast %119 : vector<8xf32> to vector<8x1xf32>
    %121 = vector.broadcast %120 : vector<8x1xf32> to vector<8x8xf32>
    %122 = arith.subf %118, %121 : vector<8x8xf32>
    %123 = math.exp %122 : vector<8x8xf32>
    %cst_46 = arith.constant dense<0.000000e+00> : vector<8xf32>
    %124 = vector.multi_reduction <add>, %123, %cst_46 [1] : vector<8x8xf32> to vector<8xf32>
    %125 = vector.shape_cast %124 : vector<8xf32> to vector<8x1xf32>
    %126 = tpu.reciprocal %125 {approx = true} : vector<8x1xf32> -> vector<8x1xf32>
    %127 = vector.broadcast %126 : vector<8x1xf32> to vector<8x8xf32>
    %128 = arith.mulf %123, %127 : vector<8x8xf32>
    %129 = arith.truncf %128 : vector<8x8xf32> to vector<8x8xbf16>
    %cst_47 = arith.constant dense<0.000000e+00> : vector<8x8xf32>
    %130 = tpu.matmul %129, %110, %cst_47 {dimension_numbers = #tpu.dot_dimension_numbers<[1], [0], [0], [1], [0, 0, 1, 1], [], []>} : vector<8x8xbf16>, vector<8x8xbf16>, vector<8x8xf32> -> vector<8x8xf32>
    %131 = arith.truncf %130 : vector<8x8xf32> to vector<8x8xbf16>
    %c0_48 = arith.constant 0 : index
    %c24 = arith.constant 24 : index
    %132 = vector.load %arg13[%c0_48, %c24] : memref<8x32xbf16, #tpu.memory_space<vmem>>, vector<8x8xbf16>
    tpu.vector_store %arg13[%c0_48, %c24], %131 {strides = array<i32>} : memref<8x32xbf16, #tpu.memory_space<vmem>>, vector<8x8xbf16>,
    %c0_49 = arith.constant 0 : index
    %c0_50 = arith.constant 0 : index
    %133 = vector.load %arg12[%c0_49, %c0_50] : memref<8x32xf32, #tpu.memory_space<vmem>>, vector<8x32xf32>
    %c0_51 = arith.constant 0 : index
    %c0_52 = arith.constant 0 : index
    %134 = vector.load %arg13[%c0_51, %c0_52] : memref<8x32xbf16, #tpu.memory_space<vmem>>, vector<8x32xbf16>
    %cst_53 = arith.constant dense<0.000000e+00> : vector<8x32xf32>
    %135 = tpu.matmul %134, %15, %cst_53 {dimension_numbers = #tpu.dot_dimension_numbers<[1], [0], [0], [1], [0, 0, 1, 1], [], []>} : vector<8x32xbf16>, vector<32x32xbf16>, vector<8x32xf32> -> vector<8x32xf32>
    %136 = arith.addf %133, %135 : vector<8x32xf32>
    %c0_54 = arith.constant 0 : index
    %c0_55 = arith.constant 0 : index
    %137 = vector.load %arg12[%c0_54, %c0_55] : memref<8x32xf32, #tpu.memory_space<vmem>>, vector<8x32xf32>
    tpu.vector_store %arg12[%c0_54, %c0_55], %136 {strides = array<i32>} : memref<8x32xf32, #tpu.memory_space<vmem>>, vector<8x32xf32>,
    %c0_i32_56 = arith.constant 0 : i32
    %138 = arith.cmpi eq, %arg1, %c0_i32_56 : i32
    %139 = arith.extui %138 : i1 to i32
    %c0_i32_57 = arith.constant 0 : i32
    %140 = arith.cmpi ne, %139, %c0_i32_57 : i32
    scf.if %140 {
      %c0_58 = arith.constant 0 : index
      %c0_59 = arith.constant 0 : index
      %141 = vector.load %arg12[%c0_58, %c0_59] : memref<8x32xf32, #tpu.memory_space<vmem>>, vector<8x32xf32>
      %c0_60 = arith.constant 0 : index
      %c0_61 = arith.constant 0 : index
      %c0_62 = arith.constant 0 : index
      %142 = vector.load %arg10[%c0_60, %c0_61, %c0_62] : memref<1x8x32xf32, #tpu.memory_space<vmem>>, vector<1x8x32xf32>
      %143 = vector.shape_cast %142 : vector<1x8x32xf32> to vector<8x32xf32>
      %144 = vector.shape_cast %141 : vector<8x32xf32> to vector<1x8x32xf32>
      tpu.vector_store %arg10[%c0_60, %c0_61, %c0_62], %144 {strides = array<i32>} : memref<1x8x32xf32, #tpu.memory_space<vmem>>, vector<1x8x32xf32>,
    } else {
    }
    return
  }
  func.func @transform_0(%arg0: i32, %arg1: i32) -> (i32, i32, i32) {
    %c0_i32 = arith.constant 0 : i32
    %c0_i32_0 = arith.constant 0 : i32
    %c0_i32_1 = arith.constant 0 : i32
    return %arg0, %c0_i32, %c0_i32_0 : i32, i32, i32
  }
  func.func @transform_1(%arg0: i32, %arg1: i32) -> (i32, i32, i32) {
    %c0_i32 = arith.constant 0 : i32
    %c0_i32_0 = arith.constant 0 : i32
    %c0_i32_1 = arith.constant 0 : i32
    return %arg0, %c0_i32, %c0_i32_0 : i32, i32, i32
  }
  func.func @transform_2(%arg0: i32, %arg1: i32) -> (i32, i32, i32, i32) {
    %c0_i32 = arith.constant 0 : i32
    %c0_i32_0 = arith.constant 0 : i32
    %c0_i32_1 = arith.constant 0 : i32
    return %arg0, %arg1, %c0_i32, %c0_i32_0 : i32, i32, i32, i32
  }
  func.func @transform_3(%arg0: i32, %arg1: i32) -> (i32, i32, i32) {
    %c0_i32 = arith.constant 0 : i32
    %c0_i32_0 = arith.constant 0 : i32
    %c0_i32_1 = arith.constant 0 : i32
    %c0_i32_2 = arith.constant 0 : i32
    return %c0_i32, %c0_i32_0, %c0_i32_1 : i32, i32, i32
  }
  func.func @transform_4(%arg0: i32, %arg1: i32) -> (i32, i32, i32) {
    %c0_i32 = arith.constant 0 : i32
    %c0_i32_0 = arith.constant 0 : i32
    %c0_i32_1 = arith.constant 0 : i32
    %c0_i32_2 = arith.constant 0 : i32
    return %c0_i32, %c0_i32_0, %c0_i32_1 : i32, i32, i32
  }
  func.func @transform_5(%arg0: i32, %arg1: i32) -> (i32, i32, i32) {
    %c0_i32 = arith.constant 0 : i32
    %c0_i32_0 = arith.constant 0 : i32
    %c0_i32_1 = arith.constant 0 : i32
    %c0_i32_2 = arith.constant 0 : i32
    return %c0_i32, %c0_i32_0, %c0_i32_1 : i32, i32, i32
  }
  func.func @transform_6(%arg0: i32, %arg1: i32) -> (i32, i32, i32) {
    %c0_i32 = arith.constant 0 : i32
    %c0_i32_0 = arith.constant 0 : i32
    %c0_i32_1 = arith.constant 0 : i32
    %c0_i32_2 = arith.constant 0 : i32
    return %c0_i32, %c0_i32_0, %c0_i32_1 : i32, i32, i32
  }
  func.func @transform_7(%arg0: i32, %arg1: i32) -> (i32, i32) {
    %c0_i32 = arith.constant 0 : i32
    %c0_i32_0 = arith.constant 0 : i32
    %c0_i32_1 = arith.constant 0 : i32
    return %c0_i32, %c0_i32_0 : i32, i32
  }
  func.func @transform_8(%arg0: i32, %arg1: i32) -> (i32, i32, i32) {
    %c0_i32 = arith.constant 0 : i32
    %c0_i32_0 = arith.constant 0 : i32
    %c0_i32_1 = arith.constant 0 : i32
    return %arg0, %c0_i32, %c0_i32_0 : i32, i32, i32
  }
}

</mosaic_0001>

<bundles_post_ra>
// kernel: tpu_custom_call.1
= control target key start
LH: loop header
LB: loop body
LE: loop exit
PB: predicated region body
PF: predicated region fallthrough
CT: control target
= control target key end

     0   :  { %s1981_s0 = inlined_call_operand.hbm [shape: f32[2,8,32], index: 0, kind: input, shape index: {}]   ;;  %s1982_s1 = inlined_call_operand.hbm [shape: f32[2,1,8], index: 1, kind: input, shape index: {}]   ;;  %s1983_s2 = inlined_call_operand.hbm [shape: bf16[2,4,8,8], index: 2, kind: input, shape index: {}]   ;;  %s1984_s3 = inlined_call_operand.hbm [shape: bf16[1,32,32], index: 3, kind: input, shape index: {}]   ;;  %s1985_s4 = inlined_call_operand.hbm [shape: bf16[1,32,32], index: 4, kind: input, shape index: {}]   ;;  %s1986_s5 = inlined_call_operand.hbm [shape: bf16[1,32,32], index: 5, kind: input, shape index: {}]   ;;  %s1987_s6 = inlined_call_operand.hbm [shape: bf16[1,32,32], index: 6, kind: input, shape index: {}]   ;;  %s1988_s7 = inlined_call_operand.vmem [shape: f32[1,32], index: 7, kind: input, shape index: {}]   ;;  %s1989_s8 = inlined_call_operand.hbm [shape: f32[2,8,32], index: 8, kind: output, shape index: {}]  }
   0x1   :  { %2001 = sst [smem:[#allocation29_spill]] %s1982_s1 }
   0x2   :  { %2002 = sst [smem:[#allocation30_spill]] %s1984_s3 }
   0x3   :  { %2003 = sst [smem:[#allocation31_spill]] %s1985_s4 }
   0x4   :  { %2004 = sst [smem:[#allocation32_spill]] %s1986_s5 }
   0x5   :  { %2005 = sst [smem:[#allocation33_spill]] %s1987_s6 }
   0x6   :  { %2006 = sst [smem:[#allocation34_spill]] %s1989_s8 }
   0x7   :  { %13 = vsyncpa [#allocation6], 0 }
   0x8   :  { %15 = vsyncpa [#allocation6 + $0x1], 0 }
   0x9   :  { %16 = vsyncpa [#allocation9], 0 }
   0xa   :  { %18 = vsyncpa [#allocation9 + $0x1], 0 }
   0xb   :  { %19 = vsyncpa [#allocation12], 0 }
   0xc   :  { %20 = vsyncpa [#allocation15], 0 }
   0xd   :  { %21 = vsyncpa [#allocation7], 0 }
   0xe   :  { %23 = vsyncpa [#allocation7 + $0x1], 0  ;;  %s1702_s27 = smov 0   ;;  %s1704_s28 = smov 0  }
   0xf   :  { %s1706_s29 = smov 0   ;;  %s1708_s30 = smov 0  }
  0x10   :  { %s1710_s9 = smov 0   ;;  %s1712_s10 = smov 0  }
  0x11 LB: > { %2007 = sst [smem:[#allocation23_spill]] %s1622_s27  ;;  %s1733_s11 = sadd.s32 4294967295, %s1642_s10   ;;  %s1642_s10 = sphi %s1712_s10, %s29_s10   ;;  %s1638_s9 = sphi %s1710_s9, %s2038_s9   ;;  %s1634_s30 = sphi %s1708_s30, %s2037_s30   ;;  %s1630_s29 = sphi %s1706_s29, %s2033_s29   ;;  %s1626_s28 = sphi %s1704_s28, %s2036_s28   ;;  %s1622_s27 = sphi %s1702_s27, %s2035_s27  }
  0x12   : > { %2008 = sst [smem:[#allocation24_spill]] %s1630_s29  ;;  %p1115_p0 = scmp.ge.s32.totalorder %s1642_s10, 1 }
  0x13   : > { %2009 = sst [smem:[#allocation25_spill]] %s1642_s10  ;;  %p62_p1 = scmp.eq.s32.totalorder %s1733_s11, 0 }
  0x14   : > { %p257_p2 = scmp.lt.s32.totalorder %s1642_s10, 3  ;;  %s2010_s3 = sld [smem:[#allocation30_spill]] }
  0x15   : > { %s1644_s16 = smov [#allocation11]   ;;  %s2013_s5 = sld [smem:[#allocation32_spill]] }
  0x16   : > { %p1741_p3 = pnand %p1115_p0, %p257_p2  ;;  %s270_s17 = sshll.u32 %s1644_s16, 4  ;;  %s271_s17 = int_to_ptr.vmem [resolvable:$true] %s270_s17 }
  0x17   : > { %s1990_s22 = smov 64   ;;  %s1992_s23 = smov 4  }
  0x18   : > { %p1218_p4 = pneg %p1741_p3  ;;  %s1647_s24 = smov [#allocation14]  }
  0x19   : > { %s298_s25 = sshll.u32 %s1647_s24, 4  ;;  %s1114_s26 = sadd.s32 4294967294, %s1642_s10   ;;  %s299_s25 = int_to_ptr.vmem [resolvable:$true] %s298_s25 }
  0x1a   : > { %s268_s14 = sshll.u32 %s2010_s3, 4  ;;  %p1749_p5 = pnand %p1218_p4, %p62_p1  ;;  %s269_s14 = int_to_ptr.hbm [resolvable:$true] %s268_s14 }
  0x1b   : > { %s296_s21 = sshll.u32 %s2013_s5, 4  ;;  %s41_s12 = sadd.s32 1, %s1638_s9  ;;  %s297_s21 = int_to_ptr.hbm [resolvable:$true] %s296_s21 }
  0x1c   : > { %1221 = dma.hbm_to_vmem [thread:$0]  (!%p1749_p5), %s269_s14, 256, %s271_s17, [#allocation12], %s1990_s22, %s1990_s22, %s1992_s23  }
  0x1d   : > { %1227 = dma.hbm_to_vmem [thread:$0]  (!%p1749_p5), %s297_s21, 256, %s299_s25, [#allocation15], %s1990_s22, %s1990_s22, %s1992_s23  }
  0x1e   : > { %p43_p7 = scmp.ge.s32.totalorder %s41_s12, 2  ;;  %s48_s13 = sadd.s32 1, %s1630_s29 }
  0x1f   : > { %p55_p8 = scmp.ne.s32.totalorder %s1630_s29, %s1626_s28  ;;  %p56_p9 = scmp.eq.s32.totalorder %s1642_s10, 0 }
  0x20   : > { %s2040_s12 = smov (%p43_p7, %s41_s12), 0  ;;  %p61_p11 = scmp.ne.s32.totalorder %s1626_s28, %s1622_s27 }
  0x21   : > { %2014 = sst [smem:[#allocation26_spill]] %s2040_s12  ;;  %p1775_p10 = por %p56_p9, %p55_p8 }
  0x22   : > { %s45_s16 = ssub.s32 %s1638_s9, %s2040_s12  ;;  %p244_p12 = scmp.eq.s32.totalorder %s1733_s11, 1 }
  0x23   : > { %p46_p13 = scmp.eq.s32.totalorder %s45_s16, 0  ;;  %p1786_p0 = por %p62_p1, %p61_p11 }
  0x24   : > { %p1790_p2 = por %p244_p12, %p55_p8  ;;  %p250_p4 = scmp.eq.s32.totalorder %s1114_s26, 1 }
  0x25   : > { %s1795_s20 = scalar_select %p46_p13, %s1630_s29, %s48_s13  }
  0x26   : > { %p1797_p7 = por %p250_p4, %p61_p11  ;;  %p1249_p9 = scmp.lt.s32.totalorder %s1642_s10, 2 }
  0x27   : > { %2018 = sst [smem:[#allocation27_spill]] %s1795_s20  ;;  %s1803_s24 = sand.u32 1, %s1630_s29  }
  0x28   : > { %s2019_s21 = scalar_select %p1797_p7, 1, 0 }
  0x29   : > { %s348_s25 = sand.u32 1, %s1642_s10   ;;  %p1808_p6 = pnand %p1249_p9, %p1775_p10 }
  0x2a   : > { %2020 = sst [smem:[#allocation28_spill]] %s2019_s21  ;;  %s351_s3 = scalar_lea.vmem [#allocation8], %s1803_s24 }
  0x2b   : > { %s2022_s1 = sld [smem:[#allocation29_spill]]  ;;  %s358_s5 = sshll.u32 %s351_s3, 4  ;;  %s359_s5 = int_to_ptr.vmem [resolvable:$true] %s358_s5 }
  0x2c   : > { %s1123_s12 = sshll.u32 %s1803_s24, 4  ;;  %s1818_s14 = scalar_lea.sflag [#allocation9], %s348_s25 }
  0x2d   : > { %s2023_s4 = sld [smem:[#allocation31_spill]]  ;;  %s1648_s23 = smov [#allocation13]  }
  0x2e   : > { %s2024_s6 = sld [smem:[#allocation33_spill]]  ;;  %s2025_s21 = smov 4  }
  0x2f   : > { %s2026_s25 = smov 64   ;;  %s1121_s20 = sshll.u32 %s1803_s24, 3 }
  0x30   : > { %s1185_s18 = sshll.u32 %s1638_s9, 4 }
  0x31   : > { %s354_s26 = scalar_lea.hbm %s2022_s1, %s1638_s9  ;;  %s1122_s1 = sshll.u32 %s1638_s9, 3 }
  0x32   : > { %s356_s13 = sshll.u32 %s354_s26, 4  ;;  %s284_s26 = sshll.u32 %s1648_s23, 4  ;;  %s357_s13 = int_to_ptr.hbm [resolvable:$true] %s356_s13  ;;  %s285_s26 = int_to_ptr.vmem [resolvable:$true] %s284_s26 }
  0x33   : > { %1237 = dma.hbm_to_vmem [thread:$0]  (!%p1808_p6), %s357_s13, 16, %s359_s5, %s1818_s14  }
  0x34   : > { %s282_s22 = sshll.u32 %s2023_s4, 4  ;;  %s310_s10 = sshll.u32 %s2024_s6, 4  ;;  %s283_s22 = int_to_ptr.hbm [resolvable:$true] %s282_s22  ;;  %s311_s10 = int_to_ptr.hbm [resolvable:$true] %s310_s10 }
  0x35   : > { %1224 = dma.hbm_to_vmem [thread:$0]  (!%p1749_p5), %s283_s22, 256, %s285_s26, [#allocation12], %s2026_s25, %s2026_s25, %s2025_s21  }
  0x36   : > { %s1649_s5 = smov [#allocation16]   ;;  %s337_s3 = scalar_lea.hbm %s1981_s0, %s1122_s1 }
  0x37   : > { %s312_s29 = sshll.u32 %s1649_s5, 4  ;;  %s333_s4 = scalar_lea.vmem [#allocation5], %s1121_s20  ;;  %s313_s29 = int_to_ptr.vmem [resolvable:$true] %s312_s29 }
  0x38   : > { %1230 = dma.hbm_to_vmem [thread:$0]  (!%p1749_p5), %s311_s10, 256, %s313_s29, [#allocation15], %s2026_s25, %s2026_s25, %s2025_s21  }
  0x39   : > { %s341_s22 = sshll.u32 %s333_s4, 4  ;;  %s339_s26 = sshll.u32 %s337_s3, 4  ;;  %s342_s22 = int_to_ptr.vmem [resolvable:$true] %s341_s22  ;;  %s340_s26 = int_to_ptr.hbm [resolvable:$true] %s339_s26 }
  0x3a   : > { %s330_s5 = scalar_lea.sflag [#allocation6], %s1803_s24  ;;  %s369_s6 = scalar_lea.vmem [#allocation10], %s1123_s12 }
  0x3b   : > { %1234 = dma.hbm_to_vmem [thread:$0]  (!%p1808_p6), %s340_s26, 128, %s342_s22, %s330_s5  }
  0x3c   : > { %s379_s27 = sshll.u32 %s369_s6, 4  ;;  %s376_s29 = scalar_lea.hbm %s1983_s2, %s1185_s18  ;;  %s380_s27 = int_to_ptr.vmem [resolvable:$true] %s379_s27 }
  0x3d   : > { %s377_s13 = sshll.u32 %s376_s29, 4  ;;  %391 = sbr.rel (%p1741_p3) target bundleno = 1297 (0x511), region = 52  ;;  %s378_s13 = int_to_ptr.hbm [resolvable:$true] %s377_s13 }
  0x3e   : > { %1240 = dma.hbm_to_vmem [thread:$0]  (!%p1808_p6), %s378_s13, 256, %s380_s27, %s1818_s14, %s2026_s25, %s2026_s25, %s2025_s21  }
  0x3f   : > { %s1860_s4 = sand.u32 (!%p1741_p3), 1, %s1626_s28  }
  0x40   : > { %s1127_s6 = sshll.u32 (!%p1741_p3), %s1860_s4, 3  ;;  %s394_s8 = scalar_lea.sflag (!%p1741_p3), [#allocation6], %s1860_s4 }
  0x41   : > { %s397_s12 = scalar_lea.vmem (!%p1741_p3), [#allocation5], %s1127_s6 }
  0x42   : > { %1601 = dma.done.wait (%p1786_p0), %s394_s8, 128  }
  0x43   : > { %1603 = vsyncadd (%p1786_p0), %s394_s8, 4294967168  ;;  %s403_s27 = sand.u32 1, %s1733_s11   ;;  %s406_s21 = scalar_lea.vmem [#allocation8], %s1860_s4 }
  0x44   : > { %s404_s15 = scalar_lea.sflag [#allocation9], %s403_s27 }
  0x45   : > { %1605 = dma.done.wait (%p1786_p0), %s404_s15, 272  }
  0x46   : > { %1607 = vsyncadd (%p1786_p0), %s404_s15, 4294967024  ;;  %s1128_s24 = sshll.u32 %s1860_s4, 4 }
  0x47   : > { %s1877_s16 = scalar_lea.vmem [#allocation10], %s1128_s24 }
  0x48   : > { %1609 = dma.done.wait (%p62_p1), [#allocation12], 512  }
  0x49   : > { %1611 = vsyncadd (%p62_p1), [#allocation12], 4294966784 }
  0x4a   : > { %1613 = dma.done.wait (%p62_p1), [#allocation15], 512  }
  0x4b   : > { %1615 = vsyncadd (%p62_p1), [#allocation15], 4294966784  ;;  %v485_v0 = vld [vmem:[%s397_s12] sm:$0xff]  ;;  %vm487_vm0 = vcmask 261120   ;;  %v1650_v3 = vmov 32.0   ;;  %v1186_v13 = vld [vmem:[#allocation11] sm:$0xff] }
  0x4c   : > { %v486_v1 = vmul.f32 %v485_v0, %v485_v0  ;;  %519 = vst.msk [vmem:[#allocation3] sm:$0xff] %vm487_vm0, %v485_v0  ;;  %1318 = vrcp.f32 %v1650_v3  ;;  %v1187_v9 = vld [vmem:[#allocation11 + $0x8] sm:$0xff]  ;;  %v1189_v10 = vld [vmem:[#allocation13 + $0x8] sm:$0xff]  ;;  %v1188_v14 = vld [vmem:[#allocation13] sm:$0xff]  ;;  %vm517_vm5 = vcmask 257024   ;;  %vm631_vm6 = vcmask 64512  }
  0x4d   : > { %v1191_v11 = vld [vmem:[#allocation14 + $0x8] sm:$0xff]  ;;  %568 = vmatpush.bf16.msra.mxu0 %v1187_v9  ;;  %593 = vmatpush.bf16.msra.mxu1 %v1189_v10  ;;  %v1190_v15 = vld [vmem:[#allocation14] sm:$0xff]  ;;  %v1316_v25 = vld [vmem:[%s1988_s7] ss:$0 sm:$0xff]  ;;  %s1651_s14 = smov 104   ;;  %s1652_s25 = smov 120  }
  0x4e   : > { %v488_v2 = vsel %vm487_vm0, %v486_v1, 0.0  ;;  %618 = vmatpush.bf16.msra.mxu2 %v1191_v11  ;;  %vm670_vm7 = vcmask 1043456   ;;  %s1653_s20 = smov 112   ;;  %v629_v50 = vld [vmem:[%s1877_s16] sm:$0xff]   ;;  %v1317_v53 = vld [vmem:[%s406_s21] ss:$0 sm:$0xff] }
  0x4f   : > { %489 = vadd.xlane.f32.xlu0 %v488_v2  ;;  %v630_v51 = vunpack.c.l.bf16 %v629_v50  ;;  %v692_v59 = vunpack.c.h.bf16 %v629_v50  ;;  %v1166_v1 = vld [vmem:[%s1877_s16 + $0x8] sm:$0xff]   ;;  %vm688_vm8 = vcmask 60416   ;;  %s1654_s1 = smov 8   ;;  %s1655_s23 = smov 24   ;;  %vm758_vm9 = vcmask 126016  }
  0x50   : > { %v762_v2 = vunpack.c.l.bf16 %v1166_v1  ;;  %s1656_s3 = smov 16   ;;  %vm825_vm10 = vcmask 191616   ;;  %vm892_vm11 = vcmask 257216   ;;  %s1182_s22 = sshll.u32 %s1634_s30, 3 }
  0x51   : > { %569 = vmatpush.bf16.msra.mxu0 %v1186_v13  ;;  %594 = vmatpush.bf16.msra.mxu1 %v1188_v14  ;;  %s2027_s18 = sld [smem:[#allocation34_spill]]  ;;  %s478_s29 = scalar_lea.vmem [#allocation17], %s1127_s6 }
  0x52   : > { %v1319_v4 = vpop.eup %1318  ;;  %619 = vmatpush.bf16.msra.mxu2 %v1190_v15  ;;  %s944_s13 = sshll.u32 %s478_s29, 4  ;;  %s932_s12 = scalar_lea.sflag [#allocation7], %s1860_s4  ;;  %s945_s13 = int_to_ptr.vmem [resolvable:$true] %s944_s13 }
  0x53   : > { %v492_v5 = vmul.f32 32.0, %v1319_v4  ;;  %vm496_vm1 = vweird.f32 %v1319_v4 }
  0x55   : > { %v493_v6 = vsub.f32 1.0, %v492_v5 }
  0x57   : > { %v494_v7 = vmul.f32 %v1319_v4, %v493_v6  ;;  %s942_s10 = scalar_lea.hbm %s2027_s18, %s1182_s22  ;;  %s1568_s6 = scalar_lea.hbm %s2027_s18, 16 }
  0x58   : > { %s946_s8 = sshll.u32 %s942_s10, 4  ;;  %s947_s8 = int_to_ptr.hbm [resolvable:$true] %s946_s8 }
  0x59   : > { %v495_v8 = vadd.f32 %v1319_v4, %v494_v7  ;;  %s1562_s30 = sshra.s32 %s947_s8, 4  ;;  %s1563_s30 = int_to_ptr.hbm [resolvable:$true] %s1562_s30 }
  0x5a   : > { %s1564_s27 = scalar_lea.hbm %s1563_s30, 8  ;;  %p1569_p6 = scmp.lt.s32.totalorder %s1563_s30, %s2027_s18 }
  0x5b   : > { %v497_v12 = vsel %vm496_vm1, %v1319_v4, %v495_v8  ;;  %v829_v4 = vunpack.c.h.bf16 %v1166_v1  ;;  %p1565_p1 = scmp.ne.s32.totalorder %s1563_s30, %s1564_s27  ;;  %p1570_p8 = scmp.lt.s32.totalorder %s1568_s6, %s1564_s27 }
  0x5d   : > { %p1566_p3 = pnand %p1565_p1, %p1790_p2  ;;  %p1571_p10 = por %p1570_p8, %p1569_p6 }
  0x5f   : > { %p1567_p5 = pneg %p1566_p3 }
  0x61   : > { %p1572_p11 = pnand %p1571_p10, %p1567_p5 }
  0xc2   : > { %v490_v16 = vpop.xlane.xlu0 %489 }
  0xc3   : > { %v498_v17 = vmul.f32 %v497_v12, %v490_v16 }
  0xc5   : > { %v499_v18 = vadd.f32 1e-06, %v498_v17 }
  0xc7   : > { %1320 = vrsqrt.f32 %v499_v18  ;;  %vm506_vm3 = vweird.f32 %v499_v18 }
  0xcd   : > { %v1321_v19 = vpop.eup %1320 }
  0xce   : > { %v501_v20 = vmul.f32 %v1321_v19, %v499_v18  ;;  %vm507_vm2 = vweird.f32 %v1321_v19 }
  0xcf   : > { %vm508_vm4 = vmor %vm506_vm3, %vm507_vm2 }
  0xd0   : > { %v502_v21 = vmul.f32 %v1321_v19, %v501_v20 }
  0xd2   : > { %v503_v22 = vmul.f32 0.5, %v502_v21 }
  0xd4   : > { %v504_v23 = vsub.f32 1.5, %v503_v22 }
  0xd6   : > { %v505_v24 = vmul.f32 %v1321_v19, %v504_v23 }
  0xd8   : > { %v509_v26 = vsel %vm508_vm4, %v1321_v19, %v505_v24 }
  0xd9   : > { %v510_v27 = vmul.f32 %v509_v26, %v485_v0 }
  0xdb   : > { %v515_v28 = vmul.f32 %v1316_v25, %v510_v27 }
  0xdd   : > { %v516_v29 = vpack.c.bf16 %v515_v28, %v515_v28 }
  0xdf   : > { %518 = vst.msk [vmem:[#allocation2] sm:$0xf] %vm517_vm5, %v516_v29 }
  0xe6   : > { %v520_v30 = vld [vmem:[#allocation2] sm:$0xf] }
  0xe7   : > { %1142 = vmatmul.msk.bf16.vlgmr.msra.gmra.mxu0 %vm487_vm0, %v520_v30  ;;  %1151 = vmatmul.msk.bf16.vlgmr.msra.gmra.mxu1 %vm487_vm0, %v520_v30 }
  0xe8   : > { %1160 = vmatmul.msk.bf16.vlgmr.msra.gmra.mxu2 %vm487_vm0, %v520_v30 }
 0x164   : > { %v571_v31 = vpop.f32.mrf.mxu0  ;;  %v596_v32 = vpop.f32.mrf.mxu1 }
 0x165   : > { %v626_v33 = vpack.c.bf16 %v571_v31, %v571_v31  ;;  %v627_v34 = vpack.c.bf16 %v596_v32, %v596_v32 }
 0x167   : > { %832 = vrot.lane.b32.xlu2 %v627_v34, %s1651_s14  ;;  %697 = vrot.lane.b32.xlu0 %v627_v34, %s1652_s25  ;;  %v636_v35 = vsel %vm631_vm6, %v627_v34, 0 }
 0x168   : > { %694 = vrot.lane.b32.xlu1 %v626_v33, %s1652_s25  ;;  %645 = vmatpush.bf16.xpose.msra.mxu3 %v636_v35 }
 0x16b   : > { %v621_v36 = vpop.f32.mrf.mxu2 }
 0x16c   : > { %v1899_v37 = vpack.c.bf16 %v621_v36, %v621_v36  ;;  %v573_v38 = vpop.f32.mrf.mxu0  ;;  %v598_v39 = vpop.f32.mrf.mxu1 }
 0x16e   : > { %v672_v40 = vsel %vm670_vm7, %v1899_v37, 0 }
 0x16f   : > { %681 = vmatpush.bf16.msrb.mxu0 %v672_v40  ;;  %763 = vrot.lane.b32.xlu2 %v626_v33, %s1653_s20 }
 0x170   : > { %765 = vrot.lane.b32.xlu1 %v627_v34, %s1653_s20  ;;  %1161 = vmatmul.msk.bf16.vlgmr.msra.gmra.mxu3 %vm631_vm6, %v626_v33 }
 0x173   : > { %v623_v41 = vpop.f32.mrf.mxu2 }
 0x178   : > { %830 = vrot.lane.b32.xlu1 %v626_v33, %s1651_s14 }
 0x1c1   : > { %v833_v42 = vpop.permute.xlu2 %832 }
 0x1c2   : > { %v838_v46 = vsel %vm631_vm6, %v833_v42, 0 }
 0x1c9   : > { %v764_v49 = vpop.permute.xlu2 %763 }
 0x1d9   : > { %v698_v43 = vpop.permute.xlu0 %697 }
 0x1da   : > { %v695_v44 = vpop.permute.xlu1 %694  ;;  %v703_v45 = vsel %vm631_vm6, %v698_v43, 0 }
 0x1db   : > { %712 = vmatpush.bf16.xpose.msrb.mxu1 %v703_v45 }
 0x1e2   : > { %v766_v47 = vpop.permute.xlu1 %765  ;;  %1164 = vmatmul.msk.bf16.vlgmr.msrb.gmra.mxu1 %vm631_vm6, %v695_v44 }
 0x1e3   : > { %847 = vmatpush.bf16.xpose.msra.mxu1 %v838_v46  ;;  %v771_v48 = vsel %vm631_vm6, %v766_v47, 0 }
 0x1e4   : > { %780 = vmatpush.bf16.xpose.msrb.mxu3 %v771_v48 }
 0x1ea   : > { %v831_v52 = vpop.permute.xlu1 %830 }
 0x1eb   : > { %1167 = vmatmul.msk.bf16.vlgmr.msrb.gmra.mxu3 %vm631_vm6, %v764_v49 }
 0x1f2   : > { %1170 = vmatmul.msk.bf16.vlgmr.msra.gmra.mxu1 %vm631_vm6, %v831_v52 }
 0x1f3   : > { %v647_v54 = vpop.f32.mrf.mxu3 }
 0x1f4   : > { %v648_v55 = vadd.f32 %v647_v54, %v630_v51 }
 0x1f6   : > { %v654_v56 = vadd.f32 %v1317_v53, %v648_v55 }
 0x1f8   : > { %v655_v57 = vsel %vm631_vm6, %v654_v56, -inf }
 0x1f9   : > { %656 = vmax.xlane.f32.xlu1 %v655_v57 }
 0x1fb   : > { %v649_v58 = vpop.f32.mrf.mxu3 }
 0x25f   : > { %v714_v60 = vpop.f32.mrf.mxu1 }
 0x260   : > { %v715_v61 = vadd.f32 %v714_v60, %v692_v59 }
 0x262   : > { %v718_v62 = vadd.f32 %v1317_v53, %v715_v61 }
 0x264   : > { %v719_v63 = vsel %vm631_vm6, %v718_v62, -inf }
 0x265   : > { %720 = vmax.xlane.f32.xlu2 %v719_v63 }
 0x267   : > { %v716_v0 = vpop.f32.mrf.mxu1 }
 0x26c   : > { %v657_v3 = vpop.xlane.xlu1 %656 }
 0x26d   : > { %v658_v5 = vsub.f32 %v654_v56, %v657_v3 }
 0x26e   : > { %v782_v6 = vpop.f32.mrf.mxu3 }
 0x26f   : > { %v659_v7 = vmul.f32 1.442695, %v658_v5  ;;  %v783_v8 = vadd.f32 %v782_v6, %v762_v2  ;;  %v849_v9 = vpop.f32.mrf.mxu1  ;;  %v1192_v5 = vld [vmem:[#allocation16] sm:$0xff] }
 0x270   : > { %v850_v10 = vadd.f32 %v849_v9, %v829_v4  ;;  %v1193_v4 = vld [vmem:[#allocation16 + $0x8] sm:$0xff] }
 0x271   : > { %1322 = vpow2.f32 %v659_v7  ;;  %v786_v11 = vadd.f32 %v1317_v53, %v783_v8  ;;  %917 = vmatpush.bf16.msra.mxu3 %v1193_v4 }
 0x272   : > { %v853_v12 = vadd.f32 %v1317_v53, %v850_v10  ;;  %v894_v10 = vld [vmem:[#allocation3] sm:$0xff] }
 0x273   : > { %v787_v13 = vsel %vm631_vm6, %v786_v11, -inf }
 0x274   : > { %788 = vmax.xlane.f32.xlu2 %v787_v13  ;;  %v854_v14 = vsel %vm631_vm6, %v853_v12, -inf }
 0x275   : > { %855 = vmax.xlane.f32.xlu0 %v854_v14  ;;  %918 = vmatpush.bf16.msra.mxu3 %v1192_v5 }
 0x276   : > { %v784_v15 = vpop.f32.mrf.mxu3 }
 0x277   : > { %v1323_v16 = vpop.eup %1322  ;;  %v851_v17 = vpop.f32.mrf.mxu1 }
 0x278   : > { %v661_v18 = vsel %vm631_vm6, %v1323_v16, 0.0 }
 0x279   : > { %662 = vadd.xlane.f32.xlu1 %v661_v18 }
 0x289   : > { %732 = vrot.lane.b32.xlu0 %v1899_v37, %s1652_s25 }
 0x2d8   : > { %v721_v19 = vpop.xlane.xlu2 %720 }
 0x2d9   : > { %v722_v20 = vsub.f32 %v718_v62, %v721_v19 }
 0x2db   : > { %v723_v21 = vmul.f32 1.442695, %v722_v20 }
 0x2dd   : > { %1324 = vpow2.f32 %v723_v21 }
 0x2e3   : > { %v1325_v22 = vpop.eup %1324 }
 0x2e4   : > { %v725_v23 = vsel %vm631_vm6, %v1325_v22, 0.0 }
 0x2e5   : > { %726 = vadd.xlane.f32.xlu2 %v725_v23 }
 0x2e7   : > { %v789_v24 = vpop.xlane.xlu2 %788 }
 0x2e8   : > { %v790_v25 = vsub.f32 %v786_v11, %v789_v24  ;;  %v856_v26 = vpop.xlane.xlu0 %855 }
 0x2e9   : > { %v857_v27 = vsub.f32 %v853_v12, %v856_v26 }
 0x2ea   : > { %v791_v28 = vmul.f32 1.442695, %v790_v25 }
 0x2eb   : > { %v858_v29 = vmul.f32 1.442695, %v857_v27 }
 0x2ec   : > { %1326 = vpow2.f32 %v791_v28  ;;  %v663_v30 = vpop.xlane.xlu1 %662 }
 0x2ed   : > { %1328 = vpow2.f32 %v858_v29 }
 0x2ee   : > { %1330 = vrcp.f32 %v663_v30 }
 0x2f2   : > { %v1327_v31 = vpop.eup %1326 }
 0x2f3   : > { %v1329_v32 = vpop.eup %1328  ;;  %v793_v33 = vsel %vm631_vm6, %v1327_v31, 0.0 }
 0x2f4   : > { %v1331_v34 = vpop.eup %1330  ;;  %794 = vadd.xlane.f32.xlu1 %v793_v33  ;;  %v860_v35 = vsel %vm631_vm6, %v1329_v32, 0.0 }
 0x2f5   : > { %v665_v36 = vmul.f32 %v1331_v34, %v1323_v16  ;;  %861 = vadd.xlane.f32.xlu2 %v860_v35 }
 0x2f7   : > { %v666_v38 = vpack.c.bf16 %v665_v36, %v665_v36 }
 0x2f9   : > { %1162 = vmatmul.msk.bf16.vlgmr.msrb.gmra.mxu0 %vm631_vm6, %v666_v38 }
 0x2fb   : > { %v733_v39 = vpop.permute.xlu0 %732 }
 0x2fc   : > { %v738_v40 = vsel %vm670_vm7, %v733_v39, 0 }
 0x2fd   : > { %747 = vmatpush.bf16.msrb.mxu2 %v738_v40 }
 0x30d   : > { %799 = vrot.lane.b32.xlu1 %v1899_v37, %s1653_s20  ;;  %866 = vrot.lane.b32.xlu2 %v1899_v37, %s1651_s14 }
 0x358   : > { %v727_v41 = vpop.xlane.xlu2 %726 }
 0x359   : > { %1332 = vrcp.f32 %v727_v41 }
 0x35f   : > { %v1333_v42 = vpop.eup %1332 }
 0x360   : > { %v729_v43 = vmul.f32 %v1333_v42, %v1325_v22 }
 0x362   : > { %v730_v44 = vpack.c.bf16 %v729_v43, %v729_v43 }
 0x364   : > { %1165 = vmatmul.msk.bf16.vlgmr.msrb.gmra.mxu2 %vm631_vm6, %v730_v44 }
 0x367   : > { %v795_v50 = vpop.xlane.xlu1 %794 }
 0x368   : > { %v862_v45 = vpop.xlane.xlu2 %861 }
 0x369   : > { %1334 = vrcp.f32 %v862_v45 }
 0x36a   : > { %1336 = vrcp.f32 %v795_v50 }
 0x36f   : > { %v1335_v46 = vpop.eup %1334 }
 0x370   : > { %v864_v47 = vmul.f32 %v1335_v46, %v1329_v32  ;;  %v867_v48 = vpop.permute.xlu2 %866  ;;  %v1337_v53 = vpop.eup %1336 }
 0x371   : > { %v872_v49 = vsel %vm670_vm7, %v867_v48, 0  ;;  %v797_v54 = vmul.f32 %v1337_v53, %v1327_v31 }
 0x372   : > { %v865_v51 = vpack.c.bf16 %v864_v47, %v864_v47  ;;  %881 = vmatpush.bf16.msra.mxu2 %v872_v49 }
 0x373   : > { %v798_v58 = vpack.c.bf16 %v797_v54, %v797_v54 }
 0x375   : > { %1171 = vmatmul.msk.bf16.vlgmr.msra.gmra.mxu2 %vm631_vm6, %v865_v51 }
 0x376   : > { %v683_v37 = vpop.f32.mrf.mxu0 }
 0x377   : > { %v687_v52 = vpack.c.bf16 %v683_v37, %v683_v37 }
 0x379   : > { %689 = vst.msk [vmem:[#allocation4] sm:$0xf] %vm688_vm8, %v687_v52 }
 0x37e   : > { %v685_v55 = vpop.f32.mrf.mxu0 }
 0x37f   : > { %v800_v56 = vpop.permute.xlu1 %799 }
 0x380   : > { %v805_v57 = vsel %vm670_vm7, %v800_v56, 0 }
 0x381   : > { %814 = vmatpush.bf16.msra.mxu0 %v805_v57 }
 0x384   : > { %1168 = vmatmul.msk.bf16.vlgmr.msra.gmra.mxu0 %vm631_vm6, %v798_v58 }
 0x3e7   : > { %v749_v59 = vpop.f32.mrf.mxu2 }
 0x3e8   : > { %v753_v60 = vpack.c.bf16 %v749_v59, %v749_v59 }
 0x3ea   : > { %755 = vrot.lane.b32.xlu0 %v753_v60, %s1654_s1 }
 0x3ef   : > { %v751_v61 = vpop.f32.mrf.mxu2 }
 0x3f8   : > { %v883_v62 = vpop.f32.mrf.mxu2 }
 0x3f9   : > { %v887_v63 = vpack.c.bf16 %v883_v62, %v883_v62 }
 0x3fb   : > { %889 = vrot.lane.b32.xlu2 %v887_v63, %s1655_s23 }
 0x400   : > { %v885_v0 = vpop.f32.mrf.mxu2 }
 0x401   : > { %v816_v1 = vpop.f32.mrf.mxu0 }
 0x402   : > { %v820_v2 = vpack.c.bf16 %v816_v1, %v816_v1 }
 0x404   : > { %822 = vrot.lane.b32.xlu0 %v820_v2, %s1656_s3 }
 0x409   : > { %v818_v3 = vpop.f32.mrf.mxu0 }
 0x455   : > { %v890_v8 = vpop.permute.xlu2 %889 }
 0x45c   : > { %v756_v6 = vpop.permute.xlu0 %755 }
 0x45d   : > { %759 = vst.msk [vmem:[#allocation4] sm:$0xf] %vm758_vm9, %v756_v6 }
 0x476   : > { %v823_v7 = vpop.permute.xlu0 %822 }
 0x477   : > { %826 = vst.msk [vmem:[#allocation4] sm:$0xf] %vm825_vm10, %v823_v7 }
 0x478   : > { %893 = vst.msk [vmem:[#allocation4] sm:$0xf] %vm892_vm11, %v890_v8 }
 0x47f   : > { %v895_v9 = vld [vmem:[#allocation4] sm:$0xf] }
 0x480   : > { %1180 = vmatmul.msk.bf16.vlgmr.msra.gmra.mxu3 %vm487_vm0, %v895_v9 }
 0x503   : > { %v920_v11 = vpop.f32.mrf.mxu3 }
 0x504   : > { %v924_v12 = vadd.f32 %v920_v11, %v894_v10 }
 0x506   : > { %925 = vst.msk [vmem:[#allocation3] sm:$0xff] %vm487_vm0, %v924_v12 }
 0x50b   : > { %v922_v13 = vpop.f32.mrf.mxu3 }
 0x50d   : > { %v929_v14 = vld [vmem:[#allocation3] sm:$0xff] }
 0x50e   : > { %930 = vst.msk [vmem:[%s478_s29] sm:$0xff] %vm487_vm0, %v929_v14 }
 0x50f   : > { %1575 = shalt.err (!%p1572_p11)
}
 0x510   : > { %1216 = dma.vmem_to_hbm [thread:$0]  (%p1790_p2), %s945_s13, 128, %s947_s8, %s932_s12  }
 0x511 PF: > { %s2028_s4 = sld [smem:[#allocation23_spill]] }
 0x512   : > { %s2030_s17 = sld [smem:[#allocation25_spill]] }
 0x517   : > { %s958_s14 = sand.u32 1, %s2028_s4  }
 0x518   : > { %p2031_p12 = scmp.ge.s32.totalorder %s2030_s17, 2  ;;  %s959_s25 = scalar_lea.sflag [#allocation7], %s958_s14 }
 0x51a   : > { %p1242_p13 = pnand %p2031_p12, %p1797_p7 }
 0x51c   : > { %p1243_p0 = pneg %p1242_p13 }
 0x51e   : > { %1617 = dma.done.wait (%p1243_p0), %s959_s25, 128  }
 0x51f   : > { %1619 = vsyncadd (%p1243_p0), %s959_s25, 4294967168  ;;  %s29_s10 = sadd.s32 1, %s2030_s17   ;;  %s2032_s20 = sld [smem:[#allocation24_spill]] }
 0x520   : > { %p26_p4 = scmp.ge.s32.totalorder %s29_s10, 4   ;;  %s2033_s29 = sld [smem:[#allocation27_spill]] }
 0x521   : > { %s2034_s19 = sld [smem:[#allocation26_spill]]  ;;  %s2035_s27 = smov %s1626_s28 }
 0x522   : > { %s2037_s30 = smov %s1638_s9 }
 0x523   :  { %28 = sbr.rel (!%p26_p4) target bundleno = 17 (0x11), region = 152 }
 0x525   : > { %s2036_s28 = smov %s2032_s20 }
 0x527   : > { %s2038_s9 = smov %s2034_s19 }
 0x528   :  { %965 = vsyncpa [#allocation6], 1 }
 0x529   :  { %967 = vsyncpa [#allocation6 + $0x1], 1 }
 0x52a   :  { %968 = vsyncpa [#allocation9], 1 }
 0x52b   :  { %970 = vsyncpa [#allocation9 + $0x1], 1 }
 0x52c   :  { %971 = vsyncpa [#allocation12], 1 }
 0x52d   :  { %972 = vsyncpa [#allocation15], 1 }
 0x52e   :  { %973 = vsyncpa [#allocation7], 1 }
 0x52f   :  { %975 = vsyncpa [#allocation7 + $0x1], 1 }

</bundles_post_ra>
